<compile_context>
chip_gen: v7x
topology: tpu7x:2x2x1
jax: 0.10.0
libtpu: 0.0.40
codegen_flags: <defaults>
</compile_context>

<pallas_src>
import functools

import jax
import jax.numpy as jnp
from jax.experimental import pallas as pl
from jax.experimental.pallas import tpu as pltpu


# ---------------------------------------------------------------------------
# Kernels
# ---------------------------------------------------------------------------
def _layer1_kernel(a_ref, xw1_ref, b1_ref, w2_ref, g1_ref, acc_ref):
    """acc += A[i,k] @ (X W1)[k]; on last k: h1 = relu(acc+b1), g1 = h1 @ W2."""
    k = pl.program_id(1)

    @pl.when(k == 0)
    def _():
        acc_ref[...] = jnp.zeros_like(acc_ref)

    acc_ref[...] += jnp.dot(a_ref[...], xw1_ref[...],
                            preferred_element_type=jnp.float32)

    @pl.when(k == pl.num_programs(1) - 1)
    def _():
        h1 = jnp.maximum(acc_ref[...] + b1_ref[...], 0.0)          # f32 VPU
        g1 = jnp.dot(h1.astype(jnp.bfloat16), w2_ref[...],
                     preferred_element_type=jnp.float32)            # fused W2
        g1_ref[...] = g1.astype(g1_ref.dtype)


def _layer2_kernel(a_ref, g1_ref, b2_ref, x_ref, o_ref, acc_ref):
    """acc += A[i,k] @ G1[k]; on last k: out = relu(x + acc + b2)."""
    k = pl.program_id(1)

    @pl.when(k == 0)
    def _():
        acc_ref[...] = jnp.zeros_like(acc_ref)

    acc_ref[...] += jnp.dot(a_ref[...], g1_ref[...],
                            preferred_element_type=jnp.float32)

    @pl.when(k == pl.num_programs(1) - 1)
    def _():
        res = x_ref[...].astype(jnp.float32) + acc_ref[...] + b2_ref[...]
        o_ref[...] = jnp.maximum(res, 0.0).astype(o_ref.dtype)


# ---------------------------------------------------------------------------
# Wrapper helpers
# ---------------------------------------------------------------------------
def _round_up(v, m):
    return (v + m - 1) // m * m


def _pick_tiles(n, row_tile, k_tile):
    """Return (padded_n, row_tile_m, k_tile_k) with both tiles dividing padded_n."""
    assert row_tile % 128 == 0 and k_tile % row_tile == 0
    p = _round_up(n, 128)                    # lane/MXU-aligned node dim
    if p <= row_tile:
        # Small graph: single K tile; split rows across two tiles when possible
        # so both v7x TensorCores get work under the "parallel" grid axis.
        tm = p // 2 if (p >= 256 and p % 256 == 0) else p
        return p, tm, p
    np_ = _round_up(n, row_tile)
    c = np_ // row_tile
    tk = row_tile
    for m in range(c, 0, -1):                # biggest K tile <= k_tile dividing np_
        if m * row_tile <= k_tile and c % m == 0:
            tk = m * row_tile
            break
    return np_, row_tile, tk


def _pad_cast(arr, shape, dtype):
    """Zero-pad to `shape` and cast; no-op when already in the target layout."""
    if tuple(arr.shape) == tuple(shape) and arr.dtype == dtype:
        return arr
    out = jnp.zeros(shape, dtype)
    return out.at[tuple(slice(0, s) for s in arr.shape)].set(arr.astype(dtype))


def _vmem_limit_bytes():
    # ~75% of physical VMEM: ≈96 MiB on v5e/v6e (128 MiB), 48 MiB on v7x (64 MiB).
    try:
        cap = pltpu.get_tpu_info().vmem_capacity_bytes
    except Exception:
        cap = 64 * 1024 * 1024
    return int(min(cap * 3 // 4, 100 * 1024 * 1024))


_VMEM_LIMIT = _vmem_limit_bytes()


def prepare_adjacency(a_hat, *, row_tile=512, k_tile=2048):
    """Hoistable O(N^2) pad + f32->bf16 cast of A_hat (do this once per graph)."""
    n = a_hat.shape[0]
    np_, _, _ = _pick_tiles(n, row_tile, k_tile)
    return _pad_cast(a_hat, (np_, np_), jnp.bfloat16)


# ---------------------------------------------------------------------------
# Forward
# ---------------------------------------------------------------------------
@functools.partial(jax.jit, static_argnames=("row_tile", "k_tile"))
def gnn_skip_block(a_hat, x, w1, b1, w2, b2, *, row_tile=512, k_tile=2048):
    """GNNSkipBlock forward (skipsum, 2 GCN layers, ReLU) as two Pallas calls.

    a_hat: [N, N] normalized adjacency (or pre-padded bf16 from
    prepare_adjacency), x: [N, D], w*: [D, D], b*: [D].
    """
    n, d = x.shape
    dp = _round_up(d, 128)                         # lane-dense feature dim
    np_, tm, tk = _pick_tiles(n, row_tile, k_tile)
    n_row, n_k = np_ // tm, np_ // tk

    # Pad + cast MXU operands to bf16 (no-ops if already padded / pre-prepared).
    a_p = _pad_cast(a_hat, (np_, np_), jnp.bfloat16)
    x_bf = _pad_cast(x, (np_, dp), jnp.bfloat16)
    w1_p = _pad_cast(w1, (dp, dp), jnp.bfloat16)
    w2_p = _pad_cast(w2, (dp, dp), jnp.bfloat16)
    b1_p = _pad_cast(b1.reshape(1, -1), (1, dp), jnp.float32)
    b2_p = _pad_cast(b2.reshape(1, -1), (1, dp), jnp.float32)

    # Hoisted layer-1 weight matmul: XW1 once in XLA (tiny DxD weight),
    # streamed as the feature operand of kernel 1.
    xw1 = jnp.dot(x_bf, w1_p,
                  preferred_element_type=jnp.float32).astype(jnp.bfloat16)

    cparams = pltpu.CompilerParams(
        dimension_semantics=("parallel", "arbitrary"),  # rows megacore-sharded
        vmem_limit_bytes=_VMEM_LIMIT,
    )

    const = pl.Buffered(1)  # grid-invariant operands: single VMEM buffer
    a_spec = pl.BlockSpec((tm, tk), lambda i, k: (i, k))       # streamed A band
    feat_k_spec = pl.BlockSpec((tk, dp), lambda i, k: (k, 0))  # streamed feat band
    b_spec = pl.BlockSpec((1, dp), lambda i, k: (0, 0), pipeline_mode=const)
    w_spec = pl.BlockSpec((dp, dp), lambda i, k: (0, 0), pipeline_mode=const)
    row_spec = pl.BlockSpec((tm, dp), lambda i, k: (i, 0))     # lane-dense tiles

    # Layer 1 (+ fused h1 @ W2 epilogue): g1 = relu(A @ XW1 + b1) @ W2, bf16.
    g1 = pl.pallas_call(
        _layer1_kernel,
        out_shape=jax.ShapeDtypeStruct((np_, dp), jnp.bfloat16),
        grid=(n_row, n_k),
        in_specs=[a_spec, feat_k_spec, b_spec, w_spec],
        out_specs=row_spec,
        scratch_shapes=[pltpu.VMEM((tm, dp), jnp.float32)],
        compiler_params=cparams,
    )(a_p, xw1, b1_p, w2_p)

    # Layer 2 + skipsum residual + block activation: out = relu(x + A @ g1 + b2).
    out_p = pl.pallas_call(
        _layer2_kernel,
        out_shape=jax.ShapeDtypeStruct((np_, dp), jnp.float32),
        grid=(n_row, n_k),
        in_specs=[a_spec, feat_k_spec, b_spec, row_spec],
        out_specs=row_spec,
        scratch_shapes=[pltpu.VMEM((tm, dp), jnp.float32)],
        compiler_params=cparams,
    )(a_p, g1, b2_p, x_bf)

    return out_p[:n, :d].astype(x.dtype)


# ---------------------------------------------------------------------------
# Reference + example
# ---------------------------------------------------------------------------
def reference_forward(a_hat, x, w1, b1, w2, b2):
    """Pure-JAX f32 reference of the same forward pass."""
    h1 = jax.nn.relu(a_hat @ (x @ w1) + b1[None, :])
    h2 = a_hat @ (h1 @ w2) + b2[None, :]
    return jax.nn.relu(x + h2)


def make_normalized_adjacency(key, n, avg_degree=4):
    """Dense symmetric-normalized adjacency A_hat = D^-1/2 (A + I) D^-1/2."""
    p = avg_degree / n
    a = (jax.random.uniform(key, (n, n)) < p).astype(jnp.float32)
    a = jnp.maximum(a, a.T)                       # symmetrize
    a = a + jnp.eye(n, dtype=jnp.float32)         # self loops
    deg = jnp.sum(a, axis=1)
    d_inv_sqrt = 1.0 / jnp.sqrt(deg)
    return a * d_inv_sqrt[:, None] * d_inv_sqrt[None, :]


if __name__ == "__main__":
    # Small shapes: N=64 nodes, D=32 features (dim_in == dim_out for skipsum).
    N, D = 64, 32
    key = jax.random.PRNGKey(0)
    k_adj, k_x, k_w1, k_b1, k_w2, k_b2 = jax.random.split(key, 6)

    a_hat = make_normalized_adjacency(k_adj, N)
    x = jax.random.normal(k_x, (N, D), dtype=jnp.float32)

    # Deterministic Glorot-style parameter init (GNNLayer weights/biases).
    scale = (2.0 / (D + D)) ** 0.5
    w1 = jax.random.normal(k_w1, (D, D), dtype=jnp.float32) * scale
    b1 = jax.random.normal(k_b1, (D,), dtype=jnp.float32) * 0.01
    w2 = jax.random.normal(k_w2, (D, D), dtype=jnp.float32) * scale
    b2 = jax.random.normal(k_b2, (D,), dtype=jnp.float32) * 0.01

    # Hoist the O(N^2) pad + bf16 cast of A_hat out of the per-call path.
    a_prep = prepare_adjacency(a_hat)

    out = gnn_skip_block(a_prep, x, w1, b1, w2, b2)
    out = jax.block_until_ready(out)

    ref = reference_forward(a_hat, x, w1, b1, w2, b2)
    assert out.shape == (N, D)
    # Tolerance relaxed vs. pure f32 because MXU operands (A, X, W) are bf16.
    assert jnp.allclose(out, ref, atol=5e-2, rtol=5e-2), "mismatch vs reference"

    print("KERNEL_OK")
</pallas_src>

<mosaic_0001>
module attributes {stable_mosaic.version = 11 : i64} {
  func.func @_layer2_kernel(%arg0: i32, %arg1: i32, %arg2: memref<128x128xbf16, #tpu.memory_space<vmem>>, %arg3: memref<128x128xbf16, #tpu.memory_space<vmem>>, %arg4: memref<1x128xf32, #tpu.memory_space<vmem>>, %arg5: memref<128x128xbf16, #tpu.memory_space<vmem>>, %arg6: memref<128x128xf32, #tpu.memory_space<vmem>>, %arg7: memref<128x128xf32, #tpu.memory_space<vmem>>) attributes {dimension_semantics = [#tpu.dimension_semantics<parallel>, #tpu.dimension_semantics<arbitrary>], iteration_bounds = array<i64: 1, 1>, scalar_prefetch = 0 : i64, scratch_operands = 1 : i64, tpu.core_type = #tpu.core_type<tc>, window_params = [{transform_indices = @transform_0, window_bounds = array<i64: 128, 128>}, {transform_indices = @transform_1, window_bounds = array<i64: 128, 128>}, {pipeline_mode = #tpu.pipeline_mode<synchronous>, transform_indices = @transform_2, window_bounds = array<i64: 1, 128>}, {transform_indices = @transform_3, window_bounds = array<i64: 128, 128>}, {transform_indices = @transform_4, window_bounds = array<i64: 128, 128>}]} {
    %c0_i32 = arith.constant 0 : i32
    %0 = arith.cmpi eq, %arg1, %c0_i32 : i32
    %1 = arith.extui %0 : i1 to i32
    %c0_i32_0 = arith.constant 0 : i32
    %2 = arith.cmpi ne, %1, %c0_i32_0 : i32
    scf.if %2 {
      %cst_10 = arith.constant 0.000000e+00 : f32
      %12 = vector.broadcast %cst_10 : f32 to vector<128x128xf32>
      %c0_11 = arith.constant 0 : index
      %c0_12 = arith.constant 0 : index
      %13 = vector.load %arg7[%c0_11, %c0_12] : memref<128x128xf32, #tpu.memory_space<vmem>>, vector<128x128xf32>
      tpu.vector_store %arg7[%c0_11, %c0_12], %12 {strides = array<i32>} : memref<128x128xf32, #tpu.memory_space<vmem>>, vector<128x128xf32>,
    } else {
    }
    %c0 = arith.constant 0 : index
    %c0_1 = arith.constant 0 : index
    %3 = vector.load %arg7[%c0, %c0_1] : memref<128x128xf32, #tpu.memory_space<vmem>>, vector<128x128xf32>
    %c0_2 = arith.constant 0 : index
    %c0_3 = arith.constant 0 : index
    %4 = vector.load %arg2[%c0_2, %c0_3] : memref<128x128xbf16, #tpu.memory_space<vmem>>, vector<128x128xbf16>
    %c0_4 = arith.constant 0 : index
    %c0_5 = arith.constant 0 : index
    %5 = vector.load %arg3[%c0_4, %c0_5] : memref<128x128xbf16, #tpu.memory_space<vmem>>, vector<128x128xbf16>
    %cst = arith.constant dense<0.000000e+00> : vector<128x128xf32>
    %6 = tpu.matmul %4, %5, %cst {dimension_numbers = #tpu.dot_dimension_numbers<[1], [0], [0], [1], [0, 0, 1, 1], [], []>} : vector<128x128xbf16>, vector<128x128xbf16>, vector<128x128xf32> -> vector<128x128xf32>
    %7 = arith.addf %3, %6 : vector<128x128xf32>
    %c0_6 = arith.constant 0 : index
    %c0_7 = arith.constant 0 : index
    %8 = vector.load %arg7[%c0_6, %c0_7] : memref<128x128xf32, #tpu.memory_space<vmem>>, vector<128x128xf32>
    tpu.vector_store %arg7[%c0_6, %c0_7], %7 {strides = array<i32>} : memref<128x128xf32, #tpu.memory_space<vmem>>, vector<128x128xf32>,
    %c0_i32_8 = arith.constant 0 : i32
    %9 = arith.cmpi eq, %arg1, %c0_i32_8 : i32
    %10 = arith.extui %9 : i1 to i32
    %c0_i32_9 = arith.constant 0 : i32
    %11 = arith.cmpi ne, %10, %c0_i32_9 : i32
    scf.if %11 {
      %c0_10 = arith.constant 0 : index
      %c0_11 = arith.constant 0 : index
      %12 = vector.load %arg5[%c0_10, %c0_11] : memref<128x128xbf16, #tpu.memory_space<vmem>>, vector<128x128xbf16>
      %13 = arith.extf %12 : vector<128x128xbf16> to vector<128x128xf32>
      %c0_12 = arith.constant 0 : index
      %c0_13 = arith.constant 0 : index
      %14 = vector.load %arg7[%c0_12, %c0_13] : memref<128x128xf32, #tpu.memory_space<vmem>>, vector<128x128xf32>
      %15 = arith.addf %13, %14 : vector<128x128xf32>
      %c0_14 = arith.constant 0 : index
      %c0_15 = arith.constant 0 : index
      %16 = vector.load %arg4[%c0_14, %c0_15] : memref<1x128xf32, #tpu.memory_space<vmem>>, vector<1x128xf32>
      %17 = vector.broadcast %16 : vector<1x128xf32> to vector<128x128xf32>
      %18 = arith.addf %15, %17 : vector<128x128xf32>
      %cst_16 = arith.constant 0.000000e+00 : f32
      %19 = vector.broadcast %cst_16 : f32 to vector<128x128xf32>
      %20 = arith.maximumf %18, %19 : vector<128x128xf32>
      %c0_17 = arith.constant 0 : index
      %c0_18 = arith.constant 0 : index
      %21 = vector.load %arg6[%c0_17, %c0_18] : memref<128x128xf32, #tpu.memory_space<vmem>>, vector<128x128xf32>
      tpu.vector_store %arg6[%c0_17, %c0_18], %20 {strides = array<i32>} : memref<128x128xf32, #tpu.memory_space<vmem>>, vector<128x128xf32>,
    } else {
    }
    return
  }
  func.func @transform_0(%arg0: i32, %arg1: i32) -> (i32, i32) {
    %c0_i32 = arith.constant 0 : i32
    return %arg0, %arg1 : i32, i32
  }
  func.func @transform_1(%arg0: i32, %arg1: i32) -> (i32, i32) {
    %c0_i32 = arith.constant 0 : i32
    %c0_i32_0 = arith.constant 0 : i32
    return %arg1, %c0_i32 : i32, i32
  }
  func.func @transform_2(%arg0: i32, %arg1: i32) -> (i32, i32) {
    %c0_i32 = arith.constant 0 : i32
    %c0_i32_0 = arith.constant 0 : i32
    %c0_i32_1 = arith.constant 0 : i32
    return %c0_i32, %c0_i32_0 : i32, i32
  }
  func.func @transform_3(%arg0: i32, %arg1: i32) -> (i32, i32) {
    %c0_i32 = arith.constant 0 : i32
    %c0_i32_0 = arith.constant 0 : i32
    return %arg0, %c0_i32 : i32, i32
  }
  func.func @transform_4(%arg0: i32, %arg1: i32) -> (i32, i32) {
    %c0_i32 = arith.constant 0 : i32
    %c0_i32_0 = arith.constant 0 : i32
    return %arg0, %c0_i32 : i32, i32
  }
}

module attributes {stable_mosaic.version = 11 : i64} {
  func.func @_layer1_kernel(%arg0: i32, %arg1: i32, %arg2: memref<128x128xbf16, #tpu.memory_space<vmem>>, %arg3: memref<128x128xbf16, #tpu.memory_space<vmem>>, %arg4: memref<1x128xf32, #tpu.memory_space<vmem>>, %arg5: memref<128x128xbf16, #tpu.memory_space<vmem>>, %arg6: memref<128x128xbf16, #tpu.memory_space<vmem>>, %arg7: memref<128x128xf32, #tpu.memory_space<vmem>>) attributes {dimension_semantics = [#tpu.dimension_semantics<parallel>, #tpu.dimension_semantics<arbitrary>], iteration_bounds = array<i64: 1, 1>, scalar_prefetch = 0 : i64, scratch_operands = 1 : i64, tpu.core_type = #tpu.core_type<tc>, window_params = [{transform_indices = @transform_0, window_bounds = array<i64: 128, 128>}, {transform_indices = @transform_1, window_bounds = array<i64: 128, 128>}, {pipeline_mode = #tpu.pipeline_mode<synchronous>, transform_indices = @transform_2, window_bounds = array<i64: 1, 128>}, {pipeline_mode = #tpu.pipeline_mode<synchronous>, transform_indices = @transform_3, window_bounds = array<i64: 128, 128>}, {transform_indices = @transform_4, window_bounds = array<i64: 128, 128>}]} {
    %c0_i32 = arith.constant 0 : i32
    %0 = arith.cmpi eq, %arg1, %c0_i32 : i32
    %1 = arith.extui %0 : i1 to i32
    %c0_i32_0 = arith.constant 0 : i32
    %2 = arith.cmpi ne, %1, %c0_i32_0 : i32
    scf.if %2 {
      %cst_10 = arith.constant 0.000000e+00 : f32
      %12 = vector.broadcast %cst_10 : f32 to vector<128x128xf32>
      %c0_11 = arith.constant 0 : index
      %c0_12 = arith.constant 0 : index
      %13 = vector.load %arg7[%c0_11, %c0_12] : memref<128x128xf32, #tpu.memory_space<vmem>>, vector<128x128xf32>
      tpu.vector_store %arg7[%c0_11, %c0_12], %12 {strides = array<i32>} : memref<128x128xf32, #tpu.memory_space<vmem>>, vector<128x128xf32>,
    } else {
    }
    %c0 = arith.constant 0 : index
    %c0_1 = arith.constant 0 : index
    %3 = vector.load %arg7[%c0, %c0_1] : memref<128x128xf32, #tpu.memory_space<vmem>>, vector<128x128xf32>
    %c0_2 = arith.constant 0 : index
    %c0_3 = arith.constant 0 : index
    %4 = vector.load %arg2[%c0_2, %c0_3] : memref<128x128xbf16, #tpu.memory_space<vmem>>, vector<128x128xbf16>
    %c0_4 = arith.constant 0 : index
    %c0_5 = arith.constant 0 : index
    %5 = vector.load %arg3[%c0_4, %c0_5] : memref<128x128xbf16, #tpu.memory_space<vmem>>, vector<128x128xbf16>
    %cst = arith.constant dense<0.000000e+00> : vector<128x128xf32>
    %6 = tpu.matmul %4, %5, %cst {dimension_numbers = #tpu.dot_dimension_numbers<[1], [0], [0], [1], [0, 0, 1, 1], [], []>} : vector<128x128xbf16>, vector<128x128xbf16>, vector<128x128xf32> -> vector<128x128xf32>
    %7 = arith.addf %3, %6 : vector<128x128xf32>
    %c0_6 = arith.constant 0 : index
    %c0_7 = arith.constant 0 : index
    %8 = vector.load %arg7[%c0_6, %c0_7] : memref<128x128xf32, #tpu.memory_space<vmem>>, vector<128x128xf32>
    tpu.vector_store %arg7[%c0_6, %c0_7], %7 {strides = array<i32>} : memref<128x128xf32, #tpu.memory_space<vmem>>, vector<128x128xf32>,
    %c0_i32_8 = arith.constant 0 : i32
    %9 = arith.cmpi eq, %arg1, %c0_i32_8 : i32
    %10 = arith.extui %9 : i1 to i32
    %c0_i32_9 = arith.constant 0 : i32
    %11 = arith.cmpi ne, %10, %c0_i32_9 : i32
    scf.if %11 {
      %c0_10 = arith.constant 0 : index
      %c0_11 = arith.constant 0 : index
      %12 = vector.load %arg7[%c0_10, %c0_11] : memref<128x128xf32, #tpu.memory_space<vmem>>, vector<128x128xf32>
      %c0_12 = arith.constant 0 : index
      %c0_13 = arith.constant 0 : index
      %13 = vector.load %arg4[%c0_12, %c0_13] : memref<1x128xf32, #tpu.memory_space<vmem>>, vector<1x128xf32>
      %14 = vector.broadcast %13 : vector<1x128xf32> to vector<128x128xf32>
      %15 = arith.addf %12, %14 : vector<128x128xf32>
      %cst_14 = arith.constant 0.000000e+00 : f32
      %16 = vector.broadcast %cst_14 : f32 to vector<128x128xf32>
      %17 = arith.maximumf %15, %16 : vector<128x128xf32>
      %18 = arith.truncf %17 : vector<128x128xf32> to vector<128x128xbf16>
      %c0_15 = arith.constant 0 : index
      %c0_16 = arith.constant 0 : index
      %19 = vector.load %arg5[%c0_15, %c0_16] : memref<128x128xbf16, #tpu.memory_space<vmem>>, vector<128x128xbf16>
      %cst_17 = arith.constant dense<0.000000e+00> : vector<128x128xf32>
      %20 = tpu.matmul %18, %19, %cst_17 {dimension_numbers = #tpu.dot_dimension_numbers<[1], [0], [0], [1], [0, 0, 1, 1], [], []>} : vector<128x128xbf16>, vector<128x128xbf16>, vector<128x128xf32> -> vector<128x128xf32>
      %21 = arith.truncf %20 : vector<128x128xf32> to vector<128x128xbf16>
      %c0_18 = arith.constant 0 : index
      %c0_19 = arith.constant 0 : index
      %22 = vector.load %arg6[%c0_18, %c0_19] : memref<128x128xbf16, #tpu.memory_space<vmem>>, vector<128x128xbf16>
      tpu.vector_store %arg6[%c0_18, %c0_19], %21 {strides = array<i32>} : memref<128x128xbf16, #tpu.memory_space<vmem>>, vector<128x128xbf16>,
    } else {
    }
    return
  }
  func.func @transform_0(%arg0: i32, %arg1: i32) -> (i32, i32) {
    %c0_i32 = arith.constant 0 : i32
    return %arg0, %arg1 : i32, i32
  }
  func.func @transform_1(%arg0: i32, %arg1: i32) -> (i32, i32) {
    %c0_i32 = arith.constant 0 : i32
    %c0_i32_0 = arith.constant 0 : i32
    return %arg1, %c0_i32 : i32, i32
  }
  func.func @transform_2(%arg0: i32, %arg1: i32) -> (i32, i32) {
    %c0_i32 = arith.constant 0 : i32
    %c0_i32_0 = arith.constant 0 : i32
    %c0_i32_1 = arith.constant 0 : i32
    return %c0_i32, %c0_i32_0 : i32, i32
  }
  func.func @transform_3(%arg0: i32, %arg1: i32) -> (i32, i32) {
    %c0_i32 = arith.constant 0 : i32
    %c0_i32_0 = arith.constant 0 : i32
    %c0_i32_1 = arith.constant 0 : i32
    return %c0_i32, %c0_i32_0 : i32, i32
  }
  func.func @transform_4(%arg0: i32, %arg1: i32) -> (i32, i32) {
    %c0_i32 = arith.constant 0 : i32
    %c0_i32_0 = arith.constant 0 : i32
    return %arg0, %c0_i32 : i32, i32
  }
}

</mosaic_0001>

<bundles_post_ra>
// kernel: gnn_skip_block.3
= control target key start
LH: loop header
LB: loop body
LE: loop exit
PB: predicated region body
PF: predicated region fallthrough
CT: control target
= control target key end

     0   :  { %s755_s1 = inlined_call_operand.vmem [shape: bf16[128,128], index: 1, kind: input, shape index: {}]   ;;  %s756_s0 = inlined_call_operand.vmem [shape: bf16[128,128], index: 0, kind: input, shape index: {}]   ;;  %s757_s3 = inlined_call_operand.vmem [shape: bf16[128,128], index: 3, kind: input, shape index: {}]   ;;  %s758_s2 = inlined_call_operand.vmem [shape: f32[1,128], index: 2, kind: input, shape index: {}]   ;;  %s759_s4 = inlined_call_operand.vmem [shape: f32[128,128], index: 4, kind: output, shape index: {}]  }
   0x1   :  { %v557_v0 = vld [vmem:[%s755_s1] sm:$0xff]   ;;  %v558_v1 = vld [vmem:[%s755_s1 + $0x8] sm:$0xff]   ;;  %v559_v2 = vld [vmem:[%s755_s1 + $0x10] sm:$0xff]  }
   0x2   :  { %509 = vmatprep.subr.bf16.mxu0 %v557_v0  ;;  %541 = vmatprep.subr.bf16.mxu1 %v557_v0  ;;  %v560_v3 = vld [vmem:[%s755_s1 + $0x18] sm:$0xff]   ;;  %v565_v4 = vld [vmem:[%s756_s0] sm:$0xff]   ;;  %v562_v7 = vld [vmem:[%s755_s1 + $0x28] sm:$0xff]  }
   0x3   :  { %510 = vmatpush3.bf16.msra.mxu0 %v557_v0  ;;  %549 = vmatpush3.bf16.msra.mxu1 %v557_v0  ;;  %v566_v5 = vld [vmem:[%s756_s0 + $0x20] sm:$0xff]   ;;  %v563_v8 = vld [vmem:[%s755_s1 + $0x30] sm:$0xff]   ;;  %v564_v9 = vld [vmem:[%s755_s1 + $0x38] sm:$0xff]  }
   0x4   :  { %511 = vmatprep.subr.bf16.mxu0 %v558_v1  ;;  %542 = vmatprep.subr.bf16.mxu1 %v558_v1  ;;  %v561_v6 = vld [vmem:[%s755_s1 + $0x20] sm:$0xff]   ;;  %v567_v10 = vld [vmem:[%s756_s0 + $0x8] sm:$0xff]   ;;  %v569_v12 = vld [vmem:[%s756_s0 + $0x10] sm:$0xff]  }
   0x5   :  { %525 = vmatprep.mubr.bf16.mxu0 %v565_v4  ;;  %533 = vmatprep.mubr.bf16.mxu1 %v566_v5  ;;  %v568_v11 = vld [vmem:[%s756_s0 + $0x28] sm:$0xff]   ;;  %v570_v13 = vld [vmem:[%s756_s0 + $0x30] sm:$0xff]   ;;  %v571_v14 = vld [vmem:[%s756_s0 + $0x18] sm:$0xff]  }
   0x6   :  { %v572_v15 = vld [vmem:[%s756_s0 + $0x38] sm:$0xff]   ;;  %v486_v16 = vld [vmem:[%s757_s3 + $0x8] sm:$0xff]   ;;  %v455_v18 = vld [vmem:[%s757_s3] sm:$0xff]  }
   0x7   :  { %512 = vmatpush3.bf16.msra.mxu0 %v558_v1  ;;  %550 = vmatpush3.bf16.msra.mxu1 %v558_v1  ;;  %v490_v17 = vld [vmem:[%s757_s3 + $0x28] sm:$0xff]   ;;  %v489_v19 = vld [vmem:[%s757_s3 + $0x20] sm:$0xff]   ;;  %v460_v20 = vunpack.c.l.bf16 %v486_v16  ;;  %v456_v22 = vunpack.c.l.bf16 %v455_v18  ;;  %v661_v24 = vld [vmem:[%s757_s3 + $0x18] sm:$0xff]   ;;  %v461_v26 = vunpack.c.h.bf16 %v486_v16  ;;  %v457_v33 = vunpack.c.h.bf16 %v455_v18 }
   0x8   :  { %513 = vmatprep.subr.bf16.mxu0 %v559_v2  ;;  %543 = vmatprep.subr.bf16.mxu1 %v559_v2  ;;  %v476_v21 = vunpack.c.l.bf16 %v490_v17  ;;  %v472_v23 = vunpack.c.l.bf16 %v489_v19  ;;  %v666_v25 = vld [vmem:[%s757_s3 + $0x38] sm:$0xff]   ;;  %v477_v27 = vunpack.c.h.bf16 %v490_v17  ;;  %v671_v28 = vld [vmem:[%s757_s3 + $0x10] sm:$0xff]   ;;  %v681_v31 = vld [vmem:[%s758_s2] ss:$0 sm:$0xff]  ;;  %v473_v34 = vunpack.c.h.bf16 %v489_v19 }
   0x9   :  { %v676_v29 = vld [vmem:[%s757_s3 + $0x30] sm:$0xff]   ;;  %v468_v39 = vunpack.c.l.bf16 %v661_v24  ;;  %v484_v40 = vunpack.c.l.bf16 %v666_v25  ;;  %v464_v45 = vunpack.c.l.bf16 %v671_v28  ;;  %v485_v4 = vunpack.c.h.bf16 %v666_v25 }
   0xa   :  { %v480_v46 = vunpack.c.l.bf16 %v676_v29 }
   0xb   :  { %514 = vmatpush3.bf16.msra.mxu0 %v559_v2  ;;  %551 = vmatpush3.bf16.msra.mxu1 %v559_v2 }
   0xc   :  { %515 = vmatprep.subr.bf16.mxu0 %v560_v3  ;;  %544 = vmatprep.subr.bf16.mxu1 %v560_v3 }
   0xf   :  { %516 = vmatpush3.bf16.msra.mxu0 %v560_v3  ;;  %552 = vmatpush3.bf16.msra.mxu1 %v560_v3  ;;  %v469_v3 = vunpack.c.h.bf16 %v661_v24 }
  0x10   :  { %517 = vmatprep.subr.bf16.mxu0 %v561_v6  ;;  %545 = vmatprep.subr.bf16.mxu1 %v561_v6 }
  0x13   :  { %518 = vmatpush3.bf16.msra.mxu0 %v561_v6  ;;  %553 = vmatpush3.bf16.msra.mxu1 %v561_v6 }
  0x14   :  { %519 = vmatprep.subr.bf16.mxu0 %v562_v7  ;;  %546 = vmatprep.subr.bf16.mxu1 %v562_v7 }
  0x17   :  { %520 = vmatpush3.bf16.msra.mxu0 %v562_v7  ;;  %554 = vmatpush3.bf16.msra.mxu1 %v562_v7 }
  0x18   :  { %521 = vmatprep.subr.bf16.mxu0 %v563_v8  ;;  %547 = vmatprep.subr.bf16.mxu1 %v563_v8 }
  0x1b   :  { %522 = vmatpush3.bf16.msra.mxu0 %v563_v8  ;;  %555 = vmatpush3.bf16.msra.mxu1 %v563_v8 }
  0x1c   :  { %523 = vmatprep.subr.bf16.mxu0 %v564_v9  ;;  %548 = vmatprep.subr.bf16.mxu1 %v564_v9 }
  0x1f   :  { %524 = vmatpush3.bf16.msra.mxu0 %v564_v9  ;;  %556 = vmatpush3.bf16.msra.mxu1 %v564_v9  ;;  %v465_v9 = vunpack.c.h.bf16 %v671_v28 }
  0x22   :  { %526 = vmatmul.mubr.bf16.vlgmr.msra.gmra.mrb[0].mxu0 %v567_v10  ;;  %534 = vmatmul.mubr.bf16.vlgmr.msra.gmra.mrb[0].mxu1 %v568_v11  ;;  %v481_v10 = vunpack.c.h.bf16 %v676_v29 }
  0x23   :  { %529 = vmatprep.mubr.bf16.mxu0 %v569_v12  ;;  %537 = vmatprep.mubr.bf16.mxu1 %v570_v13 }
  0x2a   :  { %530 = vmatmul.mubr.bf16.gmra.mrb[4].mxu0 %v571_v14  ;;  %538 = vmatmul.mubr.bf16.gmra.mrb[4].mxu1 %v572_v15 }
  0xf5   :  { %v527_v30 = vpop.f32.mrb[0].mxu0  ;;  %v535_v32 = vpop.f32.mrb[0].mxu1 }
  0xf6   :  { %v364_v35 = vadd.f32 %v527_v30, %v460_v20  ;;  %v372_v36 = vadd.f32 %v535_v32, %v476_v21  ;;  %v216_v37 = vpop.f32.mrb[1].mxu0  ;;  %v248_v38 = vpop.f32.mrb[1].mxu1 }
  0xf7   :  { %v362_v41 = vadd.f32 %v456_v22, %v216_v37  ;;  %v370_v42 = vadd.f32 %v472_v23, %v248_v38  ;;  %v528_v43 = vpop.f32.mrb[2].mxu0  ;;  %v536_v44 = vpop.f32.mrb[2].mxu1 }
  0xf8   :  { %v387_v47 = vadd.f32 %v681_v31, %v364_v35  ;;  %v395_v48 = vadd.f32 %v681_v31, %v372_v36  ;;  %v365_v49 = vadd.f32 %v528_v43, %v461_v26  ;;  %v373_v50 = vadd.f32 %v536_v44, %v477_v27  ;;  %v219_v51 = vpop.f32.mrb[3].mxu0  ;;  %v251_v52 = vpop.f32.mrb[3].mxu1 }
  0xf9   :  { %v385_v53 = vadd.f32 %v681_v31, %v362_v41  ;;  %v393_v54 = vadd.f32 %v681_v31, %v370_v42  ;;  %v363_v55 = vadd.f32 %v457_v33, %v219_v51  ;;  %v371_v56 = vadd.f32 %v473_v34, %v251_v52 }
  0xfa   :  { %v403_v57 = vmax.f32 %v387_v47, 0.0  ;;  %v411_v58 = vmax.f32 %v395_v48, 0.0  ;;  %v388_v59 = vadd.f32 %v681_v31, %v365_v49  ;;  %v396_v60 = vadd.f32 %v681_v31, %v373_v50 }
  0xfb   :  { %v401_v61 = vmax.f32 %v385_v53, 0.0  ;;  %v409_v62 = vmax.f32 %v393_v54, 0.0  ;;  %v386_v63 = vadd.f32 %v681_v31, %v363_v55  ;;  %v394_v0 = vadd.f32 %v681_v31, %v371_v56 }
  0xfc   :  { %419 = vst [vmem:[%s759_s4 + $0x10] sm:$0xff] %v403_v57  ;;  %427 = vst [vmem:[%s759_s4 + $0x50] sm:$0xff] %v411_v58  ;;  %v404_v1 = vmax.f32 %v388_v59, 0.0  ;;  %v412_v2 = vmax.f32 %v396_v60, 0.0 }
  0xfd   :  { %417 = vst [vmem:[%s759_s4] sm:$0xff] %v401_v61  ;;  %425 = vst [vmem:[%s759_s4 + $0x40] sm:$0xff] %v409_v62  ;;  %v402_v5 = vmax.f32 %v386_v63, 0.0  ;;  %v410_v6 = vmax.f32 %v394_v0, 0.0  ;;  %v531_v7 = vpop.f32.mrb[4].mxu0  ;;  %v539_v8 = vpop.f32.mrb[4].mxu1 }
  0xfe   :  { %420 = vst [vmem:[%s759_s4 + $0x18] sm:$0xff] %v404_v1  ;;  %428 = vst [vmem:[%s759_s4 + $0x58] sm:$0xff] %v412_v2  ;;  %v368_v11 = vadd.f32 %v531_v7, %v468_v39  ;;  %v376_v12 = vadd.f32 %v539_v8, %v484_v40  ;;  %v232_v13 = vpop.f32.mrb[5].mxu0  ;;  %v264_v14 = vpop.f32.mrb[5].mxu1 }
  0xff   :  { %418 = vst [vmem:[%s759_s4 + $0x8] sm:$0xff] %v402_v5  ;;  %426 = vst [vmem:[%s759_s4 + $0x48] sm:$0xff] %v410_v6  ;;  %v366_v15 = vadd.f32 %v464_v45, %v232_v13  ;;  %v374_v16 = vadd.f32 %v480_v46, %v264_v14  ;;  %v532_v17 = vpop.f32.mrb[6].mxu0  ;;  %v540_v18 = vpop.f32.mrb[6].mxu1 }
 0x100   :  { %v391_v19 = vadd.f32 %v681_v31, %v368_v11  ;;  %v399_v20 = vadd.f32 %v681_v31, %v376_v12  ;;  %v369_v21 = vadd.f32 %v532_v17, %v469_v3  ;;  %v377_v22 = vadd.f32 %v540_v18, %v485_v4  ;;  %v235_v23 = vpop.f32.mrb[7].mxu0  ;;  %v267_v24 = vpop.f32.mrb[7].mxu1 }
 0x101   :  { %v389_v25 = vadd.f32 %v681_v31, %v366_v15  ;;  %v397_v26 = vadd.f32 %v681_v31, %v374_v16  ;;  %v367_v27 = vadd.f32 %v465_v9, %v235_v23  ;;  %v375_v28 = vadd.f32 %v481_v10, %v267_v24 }
 0x102   :  { %v407_v29 = vmax.f32 %v391_v19, 0.0  ;;  %v415_v30 = vmax.f32 %v399_v20, 0.0  ;;  %v392_v32 = vadd.f32 %v681_v31, %v369_v21  ;;  %v400_v33 = vadd.f32 %v681_v31, %v377_v22 }
 0x103   :  { %v405_v34 = vmax.f32 %v389_v25, 0.0  ;;  %v413_v35 = vmax.f32 %v397_v26, 0.0  ;;  %v390_v36 = vadd.f32 %v681_v31, %v367_v27  ;;  %v398_v37 = vadd.f32 %v681_v31, %v375_v28 }
 0x104   :  { %423 = vst [vmem:[%s759_s4 + $0x30] sm:$0xff] %v407_v29  ;;  %431 = vst [vmem:[%s759_s4 + $0x70] sm:$0xff] %v415_v30  ;;  %v408_v38 = vmax.f32 %v392_v32, 0.0  ;;  %v416_v39 = vmax.f32 %v400_v33, 0.0 }
 0x105   :  { %421 = vst [vmem:[%s759_s4 + $0x20] sm:$0xff] %v405_v34  ;;  %429 = vst [vmem:[%s759_s4 + $0x60] sm:$0xff] %v413_v35  ;;  %v406_v40 = vmax.f32 %v390_v36, 0.0  ;;  %v414_v31 = vmax.f32 %v398_v37, 0.0 }
 0x106   :  { %424 = vst [vmem:[%s759_s4 + $0x38] sm:$0xff] %v408_v38  ;;  %432 = vst [vmem:[%s759_s4 + $0x78] sm:$0xff] %v416_v39 }
 0x107   :  { %422 = vst [vmem:[%s759_s4 + $0x28] sm:$0xff] %v406_v40  ;;  %430 = vst [vmem:[%s759_s4 + $0x68] sm:$0xff] %v414_v31 }

// kernel: gnn_skip_block.2
= control target key start
LH: loop header
LB: loop body
LE: loop exit
PB: predicated region body
PF: predicated region fallthrough
CT: control target
= control target key end

     0   :  { %s970_s1 = inlined_call_operand.vmem [shape: bf16[128,128], index: 1, kind: input, shape index: {}]   ;;  %s971_s0 = inlined_call_operand.vmem [shape: bf16[128,128], index: 0, kind: input, shape index: {}]   ;;  %s972_s3 = inlined_call_operand.vmem [shape: bf16[128,128], index: 3, kind: input, shape index: {}]   ;;  %s973_s2 = inlined_call_operand.vmem [shape: f32[1,128], index: 2, kind: input, shape index: {}]   ;;  %s974_s4 = inlined_call_operand.vmem [shape: bf16[128,128], index: 4, kind: output, shape index: {}]  }
   0x1   :  { %v822_v0 = vld [vmem:[%s970_s1] sm:$0xff]   ;;  %v823_v1 = vld [vmem:[%s970_s1 + $0x8] sm:$0xff]   ;;  %v824_v2 = vld [vmem:[%s970_s1 + $0x10] sm:$0xff]  }
   0x2   :  { %758 = vmatprep.subr.bf16.mxu0 %v822_v0  ;;  %v825_v3 = vld [vmem:[%s970_s1 + $0x18] sm:$0xff]   ;;  %v830_v4 = vld [vmem:[%s971_s0] sm:$0xff]   ;;  %v827_v6 = vld [vmem:[%s970_s1 + $0x28] sm:$0xff]  }
   0x3   :  { %759 = vmatpush3.bf16.msra.mxu0 %v822_v0  ;;  %774 = vmatprep.mubr.bf16.mxu0 %v830_v4  ;;  %v826_v5 = vld [vmem:[%s970_s1 + $0x20] sm:$0xff]   ;;  %v839_v8 = vld [vmem:[%s972_s3 + $0x8] sm:$0xff]   ;;  %v828_v9 = vld [vmem:[%s970_s1 + $0x30] sm:$0xff]  }
   0x4   :  { %760 = vmatprep.subr.bf16.mxu0 %v823_v1  ;;  %v838_v7 = vld [vmem:[%s972_s3] sm:$0xff]   ;;  %v840_v10 = vld [vmem:[%s972_s3 + $0x10] sm:$0xff]   ;;  %v829_v11 = vld [vmem:[%s970_s1 + $0x38] sm:$0xff]  }
   0x5   :  { %790 = vmatprep.subr.bf16.mxu1 %v838_v7  ;;  %v841_v12 = vld [vmem:[%s972_s3 + $0x18] sm:$0xff]   ;;  %v842_v13 = vld [vmem:[%s972_s3 + $0x20] sm:$0xff]   ;;  %v831_v14 = vld [vmem:[%s971_s0 + $0x8] sm:$0xff]  }
   0x6   :  { %791 = vmatpush3.bf16.msra.mxu1 %v838_v7  ;;  %v832_v15 = vld [vmem:[%s971_s0 + $0x10] sm:$0xff]   ;;  %v843_v16 = vld [vmem:[%s972_s3 + $0x28] sm:$0xff]   ;;  %v833_v17 = vld [vmem:[%s971_s0 + $0x18] sm:$0xff]  }
   0x7   :  { %761 = vmatpush3.bf16.msra.mxu0 %v823_v1  ;;  %792 = vmatprep.subr.bf16.mxu1 %v839_v8  ;;  %v834_v18 = vld [vmem:[%s971_s0 + $0x20] sm:$0xff]   ;;  %v835_v19 = vld [vmem:[%s971_s0 + $0x28] sm:$0xff]   ;;  %v836_v20 = vld [vmem:[%s971_s0 + $0x30] sm:$0xff]  }
   0x8   :  { %762 = vmatprep.subr.bf16.mxu0 %v824_v2  ;;  %v837_v21 = vld [vmem:[%s971_s0 + $0x38] sm:$0xff]   ;;  %v844_v22 = vld [vmem:[%s972_s3 + $0x30] sm:$0xff]   ;;  %v638_v24 = vld [vmem:[%s973_s2] ss:$0 sm:$0xff] }
   0x9   :  { %v845_v23 = vld [vmem:[%s972_s3 + $0x38] sm:$0xff]  }
   0xa   :  { %793 = vmatpush3.bf16.msra.mxu1 %v839_v8 }
   0xb   :  { %763 = vmatpush3.bf16.msra.mxu0 %v824_v2  ;;  %794 = vmatprep.subr.bf16.mxu1 %v840_v10 }
   0xc   :  { %764 = vmatprep.subr.bf16.mxu0 %v825_v3 }
   0xe   :  { %795 = vmatpush3.bf16.msra.mxu1 %v840_v10 }
   0xf   :  { %765 = vmatpush3.bf16.msra.mxu0 %v825_v3  ;;  %796 = vmatprep.subr.bf16.mxu1 %v841_v12 }
  0x10   :  { %766 = vmatprep.subr.bf16.mxu0 %v826_v5 }
  0x12   :  { %797 = vmatpush3.bf16.msra.mxu1 %v841_v12 }
  0x13   :  { %767 = vmatpush3.bf16.msra.mxu0 %v826_v5  ;;  %798 = vmatprep.subr.bf16.mxu1 %v842_v13 }
  0x14   :  { %768 = vmatprep.subr.bf16.mxu0 %v827_v6 }
  0x16   :  { %799 = vmatpush3.bf16.msra.mxu1 %v842_v13 }
  0x17   :  { %769 = vmatpush3.bf16.msra.mxu0 %v827_v6  ;;  %800 = vmatprep.subr.bf16.mxu1 %v843_v16 }
  0x18   :  { %770 = vmatprep.subr.bf16.mxu0 %v828_v9 }
  0x1a   :  { %801 = vmatpush3.bf16.msra.mxu1 %v843_v16 }
  0x1b   :  { %771 = vmatpush3.bf16.msra.mxu0 %v828_v9  ;;  %802 = vmatprep.subr.bf16.mxu1 %v844_v22 }
  0x1c   :  { %772 = vmatprep.subr.bf16.mxu0 %v829_v11 }
  0x1e   :  { %803 = vmatpush3.bf16.msra.mxu1 %v844_v22 }
  0x1f   :  { %773 = vmatpush3.bf16.msra.mxu0 %v829_v11  ;;  %804 = vmatprep.subr.bf16.mxu1 %v845_v23 }
  0x22   :  { %775 = vmatmul.mubr.bf16.vlgmr.msra.gmra.mrb[0].mxu0 %v831_v14  ;;  %805 = vmatpush3.bf16.msra.mxu1 %v845_v23 }
  0x23   :  { %778 = vmatprep.mubr.bf16.mxu0 %v832_v15 }
  0x2a   :  { %779 = vmatmul.mubr.bf16.gmra.mrb[4].mxu0 %v833_v17 }
  0x2b   :  { %782 = vmatprep.mubr.bf16.mxu0 %v834_v18 }
  0x32   :  { %783 = vmatmul.mubr.bf16.gmra.mrb[8].mxu0 %v835_v19 }
  0x33   :  { %786 = vmatprep.mubr.bf16.mxu0 %v836_v20 }
  0x3a   :  { %787 = vmatmul.mubr.bf16.gmra.mrb[12].mxu0 %v837_v21 }
  0xf5   :  { %v776_v25 = vpop.f32.mrb[0].mxu0 }
  0xf6   :  { %v339_v26 = vadd.f32 %v776_v25, %v638_v24  ;;  %v216_v27 = vpop.f32.mrb[1].mxu0 }
  0xf7   :  { %v337_v28 = vadd.f32 %v638_v24, %v216_v27  ;;  %v777_v29 = vpop.f32.mrb[2].mxu0 }
  0xf8   :  { %v340_v30 = vadd.f32 %v777_v29, %v638_v24  ;;  %v219_v31 = vpop.f32.mrb[3].mxu0  ;;  %v355_v33 = vmax.f32 %v339_v26, 0.0 }
  0xf9   :  { %v338_v32 = vadd.f32 %v638_v24, %v219_v31  ;;  %v353_v35 = vmax.f32 %v337_v28, 0.0 }
  0xfa   :  { %v356_v34 = vmax.f32 %v340_v30, 0.0 }
  0xfb   :  { %v354_v36 = vmax.f32 %v338_v32, 0.0 }
  0xfc   :  { %v370_v37 = vpack.c.bf16 %v356_v34, %v355_v33 }
  0xfd   :  { %v780_v38 = vpop.f32.mrb[4].mxu0  ;;  %v369_v39 = vpack.c.bf16 %v354_v36, %v353_v35 }
  0xfe   :  { %v343_v40 = vadd.f32 %v780_v38, %v638_v24  ;;  %v232_v41 = vpop.f32.mrb[5].mxu0 }
  0xff   :  { %v341_v42 = vadd.f32 %v638_v24, %v232_v41  ;;  %v781_v43 = vpop.f32.mrb[6].mxu0  ;;  %806 = vmatprep.mubr.bf16.mxu1 %v369_v39 }
 0x100   :  { %v344_v44 = vadd.f32 %v781_v43, %v638_v24  ;;  %v235_v45 = vpop.f32.mrb[7].mxu0  ;;  %807 = vmatmul.mubr.bf16.vlgmr.msra.gmra.mrb[0].mxu1 %v370_v37  ;;  %v359_v47 = vmax.f32 %v343_v40, 0.0 }
 0x101   :  { %v342_v46 = vadd.f32 %v638_v24, %v235_v45  ;;  %v357_v49 = vmax.f32 %v341_v42, 0.0 }
 0x102   :  { %v360_v48 = vmax.f32 %v344_v44, 0.0 }
 0x103   :  { %v358_v50 = vmax.f32 %v342_v46, 0.0 }
 0x104   :  { %v372_v51 = vpack.c.bf16 %v360_v48, %v359_v47 }
 0x105   :  { %v371_v52 = vpack.c.bf16 %v358_v50, %v357_v49  ;;  %v784_v53 = vpop.f32.mrb[8].mxu0 }
 0x106   :  { %v347_v54 = vadd.f32 %v784_v53, %v638_v24  ;;  %v248_v55 = vpop.f32.mrb[9].mxu0 }
 0x107   :  { %v345_v56 = vadd.f32 %v638_v24, %v248_v55  ;;  %v785_v57 = vpop.f32.mrb[10].mxu0  ;;  %810 = vmatprep.mubr.bf16.mxu1 %v371_v52 }
 0x108   :  { %v348_v58 = vadd.f32 %v785_v57, %v638_v24  ;;  %v251_v59 = vpop.f32.mrb[11].mxu0  ;;  %811 = vmatmul.mubr.bf16.gmra.mrb[4].mxu1 %v372_v51  ;;  %v363_v61 = vmax.f32 %v347_v54, 0.0 }
 0x109   :  { %v346_v60 = vadd.f32 %v638_v24, %v251_v59  ;;  %v361_v63 = vmax.f32 %v345_v56, 0.0 }
 0x10a   :  { %v364_v62 = vmax.f32 %v348_v58, 0.0 }
 0x10b   :  { %v362_v0 = vmax.f32 %v346_v60, 0.0 }
 0x10c   :  { %v374_v1 = vpack.c.bf16 %v364_v62, %v363_v61 }
 0x10d   :  { %v373_v2 = vpack.c.bf16 %v362_v0, %v361_v63  ;;  %v788_v3 = vpop.f32.mrb[12].mxu0 }
 0x10e   :  { %v351_v4 = vadd.f32 %v788_v3, %v638_v24  ;;  %v264_v5 = vpop.f32.mrb[13].mxu0 }
 0x10f   :  { %v349_v6 = vadd.f32 %v638_v24, %v264_v5  ;;  %v789_v7 = vpop.f32.mrb[14].mxu0  ;;  %814 = vmatprep.mubr.bf16.mxu1 %v373_v2 }
 0x110   :  { %v352_v8 = vadd.f32 %v789_v7, %v638_v24  ;;  %v267_v9 = vpop.f32.mrb[15].mxu0  ;;  %815 = vmatmul.mubr.bf16.gmra.mrb[8].mxu1 %v374_v1  ;;  %v367_v11 = vmax.f32 %v351_v4, 0.0 }
 0x111   :  { %v350_v10 = vadd.f32 %v638_v24, %v267_v9  ;;  %v365_v13 = vmax.f32 %v349_v6, 0.0 }
 0x112   :  { %v368_v12 = vmax.f32 %v352_v8, 0.0 }
 0x113   :  { %v366_v14 = vmax.f32 %v350_v10, 0.0 }
 0x114   :  { %v376_v15 = vpack.c.bf16 %v368_v12, %v367_v11 }
 0x115   :  { %v375_v16 = vpack.c.bf16 %v366_v14, %v365_v13 }
 0x117   :  { %818 = vmatprep.mubr.bf16.mxu1 %v375_v16 }
 0x118   :  { %819 = vmatmul.mubr.bf16.gmra.mrb[12].mxu1 %v376_v15 }
 0x1d3   :  { %v808_v17 = vpop.f32.mrb[0].mxu1 }
 0x1d4   :  { %v475_v18 = vpop.f32.mrb[1].mxu1 }
 0x1d5   :  { %v809_v19 = vpop.f32.mrb[2].mxu1 }
 0x1d6   :  { %v687_v20 = vpack.c.bf16 %v809_v19, %v808_v17  ;;  %v478_v21 = vpop.f32.mrb[3].mxu1 }
 0x1d7   :  { %v682_v22 = vpack.c.bf16 %v478_v21, %v475_v18 }
 0x1d8   :  { %719 = vst [vmem:[%s974_s4 + $0x8] sm:$0xff] %v687_v20  }
 0x1d9   :  { %683 = vst [vmem:[%s974_s4] sm:$0xff] %v682_v22  }
 0x1db   :  { %v812_v23 = vpop.f32.mrb[4].mxu1 }
 0x1dc   :  { %v491_v24 = vpop.f32.mrb[5].mxu1 }
 0x1dd   :  { %v813_v25 = vpop.f32.mrb[6].mxu1 }
 0x1de   :  { %v697_v26 = vpack.c.bf16 %v813_v25, %v812_v23  ;;  %v494_v27 = vpop.f32.mrb[7].mxu1 }
 0x1df   :  { %v692_v28 = vpack.c.bf16 %v494_v27, %v491_v24 }
 0x1e0   :  { %721 = vst [vmem:[%s974_s4 + $0x18] sm:$0xff] %v697_v26  }
 0x1e1   :  { %720 = vst [vmem:[%s974_s4 + $0x10] sm:$0xff] %v692_v28  }
 0x1e3   :  { %v816_v29 = vpop.f32.mrb[8].mxu1 }
 0x1e4   :  { %v507_v30 = vpop.f32.mrb[9].mxu1 }
 0x1e5   :  { %v817_v31 = vpop.f32.mrb[10].mxu1 }
 0x1e6   :  { %v707_v32 = vpack.c.bf16 %v817_v31, %v816_v29  ;;  %v510_v33 = vpop.f32.mrb[11].mxu1 }
 0x1e7   :  { %v702_v34 = vpack.c.bf16 %v510_v33, %v507_v30 }
 0x1e8   :  { %723 = vst [vmem:[%s974_s4 + $0x28] sm:$0xff] %v707_v32  }
 0x1e9   :  { %722 = vst [vmem:[%s974_s4 + $0x20] sm:$0xff] %v702_v34  }
 0x1eb   :  { %v820_v35 = vpop.f32.mrb[12].mxu1 }
 0x1ec   :  { %v523_v36 = vpop.f32.mrb[13].mxu1 }
 0x1ed   :  { %v821_v37 = vpop.f32.mrb[14].mxu1 }
 0x1ee   :  { %v717_v38 = vpack.c.bf16 %v821_v37, %v820_v35  ;;  %v526_v39 = vpop.f32.mrb[15].mxu1 }
 0x1ef   :  { %v712_v40 = vpack.c.bf16 %v526_v39, %v523_v36 }
 0x1f0   :  { %725 = vst [vmem:[%s974_s4 + $0x38] sm:$0xff] %v717_v38  }
 0x1f1   :  { %724 = vst [vmem:[%s974_s4 + $0x30] sm:$0xff] %v712_v40  }

</bundles_post_ra>
